<compile_context>
chip_gen: v6e
topology: v6e:2x2x1
jax: 0.10.0
libtpu: 0.0.40
codegen_flags: <defaults>
</compile_context>

<pallas_src>
import functools

import jax
import jax.numpy as jnp
from jax.experimental import pallas as pl
from jax.experimental.pallas import tpu as pltpu


_LANES = 1024  # lane-dense width (multiple of 128) -> unmasked vst, dense DMA


def _clip_kernel(min_val, max_val):
    def kernel(x_ref, o_ref):
        x = x_ref[...]
        lo = jnp.asarray(min_val, dtype=x.dtype)
        hi = jnp.asarray(max_val, dtype=x.dtype)
        o_ref[...] = jnp.clip(x, lo, hi)

    return kernel


@functools.lru_cache(maxsize=None)
def _block_byte_budget():
    """Per-block byte budget, generation-aware but conservative on failure."""
    try:
        info = pltpu.get_tpu_info()
        vmem = int(getattr(info, "vmem_capacity_bytes", 0) or 0)
        if vmem == 64 * 1024 * 1024:
            # v7x: 64 MiB VMEM/TC, ~3.2 TB/s HBM -> bigger blocks amortize the
            # ~0.35 us per-step cost. 4 MiB * (in+out) * 2 buffers = 16 MiB,
            # under the 32 MiB scoped default.
            return 4 << 20
    except Exception:
        pass
    # v5e / v6e / unknown: 2 MiB blocks -> <= 8 MiB double-buffered in+out,
    # safe under v5e's 16 MiB scoped-VMEM default, ~85% of roofline on v6e.
    return 2 << 20


def _pick_tile_rows(rows, itemsize):
    """Row-tile size: dtype-aware sublane rounding, byte-budget capped."""
    sub = 8 * max(1, 4 // itemsize)  # 8 rows f32, 16 bf16, 32 int8/fp8
    budget = _block_byte_budget()
    max_rows = max(sub, (budget // (_LANES * itemsize)) // sub * sub)
    if rows <= sub:
        # Single full-extent block (legal even if rows is not a sublane
        # multiple, since the block equals the full array dim).
        return rows
    if rows <= max_rows:
        # Split into (at least) two tiles so v7x can shard the "parallel"
        # row axis across both TensorCores; the last block may be ragged and
        # is masked by Pallas.
        half = -(-rows // 2)
        return min(max_rows, -(-half // sub) * sub)
    return max_rows


def _clip_2d(x2d, min_val, max_val):
    rows, lanes = x2d.shape
    tile_rows = _pick_tile_rows(int(rows), x2d.dtype.itemsize)
    grid = (pl.cdiv(int(rows), tile_rows),)

    return pl.pallas_call(
        _clip_kernel(min_val, max_val),
        out_shape=jax.ShapeDtypeStruct((rows, lanes), x2d.dtype),
        grid_spec=pltpu.PrefetchScalarGridSpec(
            num_scalar_prefetch=0,
            grid=grid,
            in_specs=[pl.BlockSpec((tile_rows, lanes), lambda i: (i, 0))],
            out_specs=pl.BlockSpec((tile_rows, lanes), lambda i: (i, 0)),
        ),
        compiler_params=pltpu.CompilerParams(
            # Independent row tiles -> shard across TensorCores on v7x.
            dimension_semantics=("parallel",),
        ),
    )(x2d)


def _zscore_clipping_impl(x, *, min_val, max_val):
    orig_shape = x.shape
    n = x.size
    lo = jnp.asarray(min_val, dtype=x.dtype)
    hi = jnp.asarray(max_val, dtype=x.dtype)

    if n == 0:
        return x
    if n < _LANES:
        # Tiny input: a kernel launch is pure overhead; clip directly in XLA.
        return jnp.clip(x, lo, hi)

    flat = x.reshape(-1)
    n_main = (n // _LANES) * _LANES

    if n_main == n:
        # Aligned (common) case: reshape is a bitcast, no extra HBM traffic.
        out2d = _clip_2d(flat.reshape(-1, _LANES), min_val, max_val)
        return out2d.reshape(orig_shape)

    # Ragged case: Pallas on the aligned prefix, XLA clip on the <1024-element
    # tail, stitched back together (no whole-array pad / slice passes).
    main = _clip_2d(flat[:n_main].reshape(-1, _LANES), min_val, max_val)
    tail = jnp.clip(flat[n_main:], lo, hi)
    return jnp.concatenate([main.reshape(-1), tail]).reshape(orig_shape)


_zscore_clipping_jit = jax.jit(
    _zscore_clipping_impl, static_argnames=("min_val", "max_val")
)


def zscore_clipping(x, min_val=-3.0, max_val=3.0):
    """Pallas equivalent of ZScoreClipping.forward: clip(x, min_val, max_val)."""
    return _zscore_clipping_jit(x, min_val=float(min_val), max_val=float(max_val))


if __name__ == "__main__":
    key = jax.random.PRNGKey(0)

    # Main test: NCHW input consistent with the dataloader module; scaled so
    # values actually exceed the +/-3 clip range.  n = 2048 (lane-aligned).
    x = 4.0 * jax.random.normal(key, (2, 4, 16, 16), dtype=jnp.float32)
    y = jax.block_until_ready(zscore_clipping(x, -3.0, 3.0))
    ref = jnp.clip(x, -3.0, 3.0)
    assert y.shape == x.shape and y.dtype == x.dtype
    assert jnp.allclose(y, ref, atol=0.0), float(jnp.max(jnp.abs(y - ref)))

    # Ragged-tail case (n = 2176, not a multiple of 1024): prefix + tail path.
    k1, k2 = jax.random.split(key)
    x2 = 4.0 * jax.random.normal(k1, (2, 4, 16, 17), dtype=jnp.float32)
    y2 = jax.block_until_ready(zscore_clipping(x2, -3.0, 3.0))
    assert jnp.allclose(y2, jnp.clip(x2, -3.0, 3.0), atol=0.0)

    # Multi-tile case (rows = 26 > 8): two row tiles, ragged last block.
    x3 = 4.0 * jax.random.normal(k2, (13, 16, 128), dtype=jnp.float32)
    y3 = jax.block_until_ready(zscore_clipping(x3, -3.0, 3.0))
    assert jnp.allclose(y3, jnp.clip(x3, -3.0, 3.0), atol=0.0)

    print("KERNEL_OK")
</pallas_src>

<mosaic_0001>
module attributes {stable_mosaic.version = 11 : i64} {
  func.func @kernel(%arg0: i32, %arg1: memref<2x1024xf32, #tpu.memory_space<vmem>>, %arg2: memref<2x1024xf32, #tpu.memory_space<vmem>>) attributes {dimension_semantics = [#tpu.dimension_semantics<parallel>], iteration_bounds = array<i64: 1>, scalar_prefetch = 0 : i64, scratch_operands = 0 : i64, tpu.core_type = #tpu.core_type<tc>, window_params = [{transform_indices = @transform_0, window_bounds = array<i64: 2, 1024>}, {transform_indices = @transform_1, window_bounds = array<i64: 2, 1024>}]} {
    %c0 = arith.constant 0 : index
    %c0_0 = arith.constant 0 : index
    %0 = vector.load %arg1[%c0, %c0_0] : memref<2x1024xf32, #tpu.memory_space<vmem>>, vector<2x1024xf32>
    %cst = arith.constant -3.000000e+00 : f32
    %cst_1 = arith.constant 3.000000e+00 : f32
    %1 = vector.broadcast %cst : f32 to vector<2x1024xf32>
    %2 = arith.maximumf %1, %0 : vector<2x1024xf32>
    %3 = vector.broadcast %cst_1 : f32 to vector<2x1024xf32>
    %4 = arith.minimumf %3, %2 : vector<2x1024xf32>
    %c0_2 = arith.constant 0 : index
    %c0_3 = arith.constant 0 : index
    %5 = vector.load %arg2[%c0_2, %c0_3] : memref<2x1024xf32, #tpu.memory_space<vmem>>, vector<2x1024xf32>
    tpu.vector_store %arg2[%c0_2, %c0_3], %4 {strides = array<i32>} : memref<2x1024xf32, #tpu.memory_space<vmem>>, vector<2x1024xf32>,
    return
  }
  func.func @transform_0(%arg0: i32) -> (i32, i32) {
    %c0_i32 = arith.constant 0 : i32
    %c0_i32_0 = arith.constant 0 : i32
    return %arg0, %c0_i32 : i32, i32
  }
  func.func @transform_1(%arg0: i32) -> (i32, i32) {
    %c0_i32 = arith.constant 0 : i32
    %c0_i32_0 = arith.constant 0 : i32
    return %arg0, %c0_i32 : i32, i32
  }
}

</mosaic_0001>

<bundles_post_ra>
// kernel: _zscore_clipping_impl.1
= control target key start
LH: loop header
LB: loop body
LE: loop exit
PB: predicated region body
PF: predicated region fallthrough
CT: control target
= control target key end

     0   :  { %s44_s0 = inlined_call_operand.vmem [shape: f32[2,1024], index: 0, kind: input, shape index: {}]   ;;  %s45_s1 = inlined_call_operand.vmem [shape: f32[2,1024], index: 1, kind: output, shape index: {}]  }
   0x1   :  { %v8_v0 = vld [vmem:[%s44_s0] sm:$0xff]  ;;  %v9_v1 = vld [vmem:[%s44_s0 + $0x8] sm:$0xff] }
   0x2   :  { %v20_v2 = vclamps-f32 %v8_v0, 3.0  ;;  %v21_v3 = vclamps-f32 %v9_v1, 3.0 }
   0x4   :  { %14 = vst [vmem:[%s45_s1] sm:$0xff] %v20_v2  ;;  %15 = vst [vmem:[%s45_s1 + $0x8] sm:$0xff] %v21_v3 }

</bundles_post_ra>
